<compile_context>
chip_gen: v5e
topology: v5e:2x2
jax: 0.10.0
libtpu: 0.0.40
codegen_flags: <defaults>
</compile_context>

<pallas_src>
import jax
import jax.numpy as jnp
from jax.experimental import pallas as pl
from jax.experimental.pallas import tpu as pltpu

LANES = 128
MAX_TILE_ROWS = 2048   # 2048 * 128 * 4B = 1 MiB per f32 input block; 3 inputs x 2 bufs = 6 MiB VMEM
NUM_CORES = 2          # shard row-blocks across 2 TCs on v7x; just a serial outer loop on 1-TC chips


def _make_nmse_kernel(tile_rows: int, sub: int, rows: int, num_inner: int):
    """Builds the kernel. `rows` = valid rows in the (rows, 128) slab."""

    def kernel(x_ref, t_ref, s_ref, num_ref, den_ref):
        c = pl.program_id(0)   # core / outer split
        i = pl.program_id(1)   # inner (reduction) step

        @pl.when(i == 0)
        def _():
            num_ref[...] = jnp.zeros_like(num_ref)
            den_ref[...] = jnp.zeros_like(den_ref)

        # Unclamped logical row-block index; the index_map clamps the DMA, and this
        # mask zeroes any out-of-range / duplicated rows (and the ragged last block).
        blk = c * num_inner + i
        row0 = blk * tile_rows
        row_ids = row0 + jax.lax.broadcasted_iota(jnp.int32, (tile_rows, LANES), 0)
        valid = row_ids < rows

        x = x_ref[...].astype(jnp.float32)
        t = t_ref[...].astype(jnp.float32)
        s = s_ref[...].astype(jnp.float32)

        dx = jnp.where(valid, x - t, 0.0)
        ds = jnp.where(valid, s - t, 0.0)

        # Fold (tile_rows, 128) -> (1, sub, 128) per-lane partials: the reshape keeps
        # the (8,128) vreg tile intact, so the sum is a chain of vreg adds (VPU only).
        num_ref[...] += (dx * dx).reshape(1, tile_rows // sub, sub, LANES).sum(axis=1)
        den_ref[...] += (ds * ds).reshape(1, tile_rows // sub, sub, LANES).sum(axis=1)

    return kernel


def my_metric(inputs: jax.Array, target: jax.Array, start: jax.Array) -> jax.Array:
    """Pallas equivalent of F.mse_loss(inputs, target) / (F.mse_loss(start, target) + 1e-8)."""
    assert inputs.shape == target.shape == start.shape
    eps = 1e-08
    n_true = inputs.size

    # Only a tiny lane-tail pad (<= 127 elems) when needed; no dtype cast here.
    pad = (-n_true) % LANES

    def to_slab(a):
        flat = a.reshape(-1)
        if pad:
            flat = jnp.pad(flat, (0, pad))  # identical zero pad in all 3 -> contributes 0
        return flat.reshape(-1, LANES)

    x2d = to_slab(inputs)
    t2d = to_slab(target)
    s2d = to_slab(start)
    rows = x2d.shape[0]

    # Tile rows: as big as possible (<= MAX_TILE_ROWS), multiple of 8 when rows > 8,
    # never larger than the slab itself.
    if rows <= 8:
        tile_rows = rows
    else:
        tile_rows = min(MAX_TILE_ROWS, (rows // 8) * 8)
    sub = 8 if tile_rows % 8 == 0 else tile_rows

    row_blocks = pl.cdiv(rows, tile_rows)
    num_inner = pl.cdiv(row_blocks, NUM_CORES)
    grid = (NUM_CORES, num_inner)

    def in_map(c, i):
        # Clamp so every DMA stays in bounds; the kernel's row mask zeroes any
        # out-of-range / duplicated block so nothing is double counted.
        return (jnp.minimum(c * num_inner + i, row_blocks - 1), 0)

    in_spec = pl.BlockSpec((tile_rows, LANES), in_map)
    out_spec = pl.BlockSpec((1, sub, LANES), lambda c, i: (c, 0, 0))

    kernel = _make_nmse_kernel(tile_rows, sub, rows, num_inner)

    out_num, out_den = pl.pallas_call(
        kernel,
        out_shape=(
            jax.ShapeDtypeStruct((NUM_CORES, sub, LANES), jnp.float32),
            jax.ShapeDtypeStruct((NUM_CORES, sub, LANES), jnp.float32),
        ),
        grid_spec=pltpu.PrefetchScalarGridSpec(
            num_scalar_prefetch=0,
            grid=grid,
            in_specs=[in_spec, in_spec, in_spec],
            out_specs=[out_spec, out_spec],
        ),
        compiler_params=pltpu.CompilerParams(
            dimension_semantics=("parallel", "arbitrary"),
        ),
    )(x2d, t2d, s2d)

    # Single tiny cross-lane reduce (2 * sub * 128 f32 each) + ratio, done in JAX.
    inv_n = 1.0 / float(n_true)
    mse_num = jnp.sum(out_num) * inv_n
    mse_den = jnp.sum(out_den) * inv_n
    return mse_num / (mse_den + eps)


def my_metric_ref(inputs, target, start):
    eps = 1e-08
    mse1 = jnp.mean((inputs - target) ** 2)
    mse2 = jnp.mean((start - target) ** 2)
    return mse1 / (mse2 + eps)


if __name__ == "__main__":
    key = jax.random.PRNGKey(0)
    k1, k2, k3 = jax.random.split(key, 3)
    shape = (2, 4, 16, 16)  # batch=2, channels=4, spatial=16x16
    inputs = jax.random.normal(k1, shape, dtype=jnp.float32)
    target = jax.random.normal(k2, shape, dtype=jnp.float32)
    start = jax.random.normal(k3, shape, dtype=jnp.float32)

    out = my_metric(inputs, target, start)
    out = jax.block_until_ready(out)

    ref = my_metric_ref(inputs, target, start)
    assert jnp.allclose(out, ref, rtol=1e-5, atol=1e-6), (out, ref)

    print("KERNEL_OK")
</pallas_src>

<mosaic_0001>
module attributes {stable_mosaic.version = 11 : i64} {
  func.func @kernel(%arg0: i32, %arg1: i32, %arg2: memref<16x128xf32, #tpu.memory_space<vmem>>, %arg3: memref<16x128xf32, #tpu.memory_space<vmem>>, %arg4: memref<16x128xf32, #tpu.memory_space<vmem>>, %arg5: memref<1x8x128xf32, #tpu.memory_space<vmem>>, %arg6: memref<1x8x128xf32, #tpu.memory_space<vmem>>) attributes {dimension_semantics = [#tpu.dimension_semantics<parallel>, #tpu.dimension_semantics<arbitrary>], iteration_bounds = array<i64: 2, 1>, scalar_prefetch = 0 : i64, scratch_operands = 0 : i64, tpu.core_type = #tpu.core_type<tc>, window_params = [{transform_indices = @transform_0, window_bounds = array<i64: 16, 128>}, {transform_indices = @transform_1, window_bounds = array<i64: 16, 128>}, {transform_indices = @transform_2, window_bounds = array<i64: 16, 128>}, {transform_indices = @transform_3, window_bounds = array<i64: 1, 8, 128>}, {transform_indices = @transform_4, window_bounds = array<i64: 1, 8, 128>}]} {
    %c0_i32 = arith.constant 0 : i32
    %0 = arith.cmpi eq, %arg1, %c0_i32 : i32
    %1 = arith.extui %0 : i1 to i32
    %c0_i32_0 = arith.constant 0 : i32
    %2 = arith.cmpi ne, %1, %c0_i32_0 : i32
    scf.if %2 {
      %cst_22 = arith.constant 0.000000e+00 : f32
      %32 = vector.broadcast %cst_22 : f32 to vector<1x8x128xf32>
      %c0_23 = arith.constant 0 : index
      %c0_24 = arith.constant 0 : index
      %c0_25 = arith.constant 0 : index
      %33 = vector.load %arg5[%c0_23, %c0_24, %c0_25] : memref<1x8x128xf32, #tpu.memory_space<vmem>>, vector<1x8x128xf32>
      tpu.vector_store %arg5[%c0_23, %c0_24, %c0_25], %32 {strides = array<i32>} : memref<1x8x128xf32, #tpu.memory_space<vmem>>, vector<1x8x128xf32>,
      %cst_26 = arith.constant 0.000000e+00 : f32
      %34 = vector.broadcast %cst_26 : f32 to vector<1x8x128xf32>
      %c0_27 = arith.constant 0 : index
      %c0_28 = arith.constant 0 : index
      %c0_29 = arith.constant 0 : index
      %35 = vector.load %arg6[%c0_27, %c0_28, %c0_29] : memref<1x8x128xf32, #tpu.memory_space<vmem>>, vector<1x8x128xf32>
      tpu.vector_store %arg6[%c0_27, %c0_28, %c0_29], %34 {strides = array<i32>} : memref<1x8x128xf32, #tpu.memory_space<vmem>>, vector<1x8x128xf32>,
    } else {
    }
    %c1_i32 = arith.constant 1 : i32
    %3 = arith.muli %arg0, %c1_i32 : i32
    %4 = arith.addi %3, %arg1 : i32
    %c16_i32 = arith.constant 16 : i32
    %5 = arith.muli %4, %c16_i32 : i32
    %6 = tpu.iota {dimensions = array<i32: 0>} : vector<16x128xi32>
    %7 = vector.broadcast %5 : i32 to vector<16x128xi32>
    %8 = arith.addi %7, %6 : vector<16x128xi32>
    %c16_i32_1 = arith.constant 16 : i32
    %9 = vector.broadcast %c16_i32_1 : i32 to vector<16x128xi32>
    %10 = arith.cmpi slt, %8, %9 : vector<16x128xi32>
    %c0 = arith.constant 0 : index
    %c0_2 = arith.constant 0 : index
    %11 = vector.load %arg2[%c0, %c0_2] : memref<16x128xf32, #tpu.memory_space<vmem>>, vector<16x128xf32>
    %c0_3 = arith.constant 0 : index
    %c0_4 = arith.constant 0 : index
    %12 = vector.load %arg3[%c0_3, %c0_4] : memref<16x128xf32, #tpu.memory_space<vmem>>, vector<16x128xf32>
    %c0_5 = arith.constant 0 : index
    %c0_6 = arith.constant 0 : index
    %13 = vector.load %arg4[%c0_5, %c0_6] : memref<16x128xf32, #tpu.memory_space<vmem>>, vector<16x128xf32>
    %14 = arith.subf %11, %12 : vector<16x128xf32>
    %cst = arith.constant 0.000000e+00 : f32
    %15 = vector.broadcast %cst : f32 to vector<16x128xf32>
    %16 = arith.select %10, %14, %15 : vector<16x128xi1>, vector<16x128xf32>
    %17 = arith.subf %13, %12 : vector<16x128xf32>
    %cst_7 = arith.constant 0.000000e+00 : f32
    %18 = vector.broadcast %cst_7 : f32 to vector<16x128xf32>
    %19 = arith.select %10, %17, %18 : vector<16x128xi1>, vector<16x128xf32>
    %c0_8 = arith.constant 0 : index
    %c0_9 = arith.constant 0 : index
    %c0_10 = arith.constant 0 : index
    %20 = vector.load %arg5[%c0_8, %c0_9, %c0_10] : memref<1x8x128xf32, #tpu.memory_space<vmem>>, vector<1x8x128xf32>
    %21 = arith.mulf %16, %16 : vector<16x128xf32>
    %22 = vector.shape_cast %21 : vector<16x128xf32> to vector<1x2x8x128xf32>
    %cst_11 = arith.constant dense<0.000000e+00> : vector<1x8x128xf32>
    %23 = vector.multi_reduction <add>, %22, %cst_11 [1] : vector<1x2x8x128xf32> to vector<1x8x128xf32>
    %24 = arith.addf %20, %23 : vector<1x8x128xf32>
    %c0_12 = arith.constant 0 : index
    %c0_13 = arith.constant 0 : index
    %c0_14 = arith.constant 0 : index
    %25 = vector.load %arg5[%c0_12, %c0_13, %c0_14] : memref<1x8x128xf32, #tpu.memory_space<vmem>>, vector<1x8x128xf32>
    tpu.vector_store %arg5[%c0_12, %c0_13, %c0_14], %24 {strides = array<i32>} : memref<1x8x128xf32, #tpu.memory_space<vmem>>, vector<1x8x128xf32>,
    %c0_15 = arith.constant 0 : index
    %c0_16 = arith.constant 0 : index
    %c0_17 = arith.constant 0 : index
    %26 = vector.load %arg6[%c0_15, %c0_16, %c0_17] : memref<1x8x128xf32, #tpu.memory_space<vmem>>, vector<1x8x128xf32>
    %27 = arith.mulf %19, %19 : vector<16x128xf32>
    %28 = vector.shape_cast %27 : vector<16x128xf32> to vector<1x2x8x128xf32>
    %cst_18 = arith.constant dense<0.000000e+00> : vector<1x8x128xf32>
    %29 = vector.multi_reduction <add>, %28, %cst_18 [1] : vector<1x2x8x128xf32> to vector<1x8x128xf32>
    %30 = arith.addf %26, %29 : vector<1x8x128xf32>
    %c0_19 = arith.constant 0 : index
    %c0_20 = arith.constant 0 : index
    %c0_21 = arith.constant 0 : index
    %31 = vector.load %arg6[%c0_19, %c0_20, %c0_21] : memref<1x8x128xf32, #tpu.memory_space<vmem>>, vector<1x8x128xf32>
    tpu.vector_store %arg6[%c0_19, %c0_20, %c0_21], %30 {strides = array<i32>} : memref<1x8x128xf32, #tpu.memory_space<vmem>>, vector<1x8x128xf32>,
    return
  }
  func.func @transform_0(%arg0: i32, %arg1: i32) -> (i32, i32) {
    %c1_i32 = arith.constant 1 : i32
    %0 = arith.muli %arg0, %c1_i32 : i32
    %1 = arith.addi %0, %arg1 : i32
    %c0_i32 = arith.constant 0 : i32
    %2 = arith.minsi %1, %c0_i32 : i32
    %c0_i32_0 = arith.constant 0 : i32
    %c0_i32_1 = arith.constant 0 : i32
    return %2, %c0_i32_0 : i32, i32
  }
  func.func @transform_1(%arg0: i32, %arg1: i32) -> (i32, i32) {
    %c1_i32 = arith.constant 1 : i32
    %0 = arith.muli %arg0, %c1_i32 : i32
    %1 = arith.addi %0, %arg1 : i32
    %c0_i32 = arith.constant 0 : i32
    %2 = arith.minsi %1, %c0_i32 : i32
    %c0_i32_0 = arith.constant 0 : i32
    %c0_i32_1 = arith.constant 0 : i32
    return %2, %c0_i32_0 : i32, i32
  }
  func.func @transform_2(%arg0: i32, %arg1: i32) -> (i32, i32) {
    %c1_i32 = arith.constant 1 : i32
    %0 = arith.muli %arg0, %c1_i32 : i32
    %1 = arith.addi %0, %arg1 : i32
    %c0_i32 = arith.constant 0 : i32
    %2 = arith.minsi %1, %c0_i32 : i32
    %c0_i32_0 = arith.constant 0 : i32
    %c0_i32_1 = arith.constant 0 : i32
    return %2, %c0_i32_0 : i32, i32
  }
  func.func @transform_3(%arg0: i32, %arg1: i32) -> (i32, i32, i32) {
    %c0_i32 = arith.constant 0 : i32
    %c0_i32_0 = arith.constant 0 : i32
    %c0_i32_1 = arith.constant 0 : i32
    return %arg0, %c0_i32, %c0_i32_0 : i32, i32, i32
  }
  func.func @transform_4(%arg0: i32, %arg1: i32) -> (i32, i32, i32) {
    %c0_i32 = arith.constant 0 : i32
    %c0_i32_0 = arith.constant 0 : i32
    %c0_i32_1 = arith.constant 0 : i32
    return %arg0, %c0_i32, %c0_i32_0 : i32, i32, i32
  }
}

</mosaic_0001>

<bundles_post_ra>
// kernel: tpu_custom_call.1
= control target key start
LH: loop header
LB: loop body
LE: loop exit
PB: predicated region body
PF: predicated region fallthrough
CT: control target
= control target key end

     0   :  { %s1219_s0 = inlined_call_operand.hbm [shape: f32[16,128], index: 0, kind: input, shape index: {}]   ;;  %s1220_s1 = inlined_call_operand.hbm [shape: f32[16,128], index: 1, kind: input, shape index: {}]   ;;  %s1221_s2 = inlined_call_operand.hbm [shape: f32[16,128], index: 2, kind: input, shape index: {}]   ;;  %s1222_s3 = inlined_call_operand.hbm [shape: f32[2,8,128], index: 3, kind: output, shape index: {0}]   ;;  %s1223_s4 = inlined_call_operand.hbm [shape: f32[2,8,128], index: 4, kind: output, shape index: {1}]  }
   0x1   :  { %1228 = sst [smem:[#allocation17_spill]] %s1220_s1 }
   0x2   :  { %10 = vsyncpa [#allocation3], 0 }
   0x3   :  { %12 = vsyncpa [#allocation3 + $0x1], 0 }
   0x4   :  { %13 = vsyncpa [#allocation6], 0 }
   0x5   :  { %15 = vsyncpa [#allocation6 + $0x1], 0 }
   0x6   :  { %16 = vsyncpa [#allocation4], 0 }
   0x7   :  { %18 = vsyncpa [#allocation4 + $0x1], 0 }
   0x8   :  { %19 = vsyncpa [#allocation10], 0 }
   0x9   :  { %21 = vsyncpa [#allocation10 + $0x1], 0  ;;  %s986_s15 = smov 0   ;;  %s988_s16 = smov 0  }
   0xa   :  { %s990_s17 = smov 0   ;;  %s992_s18 = smov 0  }
   0xb   :  { %s994_s19 = smov 0   ;;  %s996_s20 = smov 0  }
   0xc   :  { %s998_s21 = smov 0   ;;  %s1000_s22 = smov 0  }
   0xd LB: > { %1229 = sst [smem:[#allocation15_spill]] %s950_s21  ;;  %s1025_s23 = sadd.s32 4294967295, %s954_s22   ;;  %s954_s22 = sphi %s1000_s22, %s27_s22   ;;  %s950_s21 = sphi %s998_s21, %s1240_s21   ;;  %s946_s20 = sphi %s996_s20, %s1239_s20   ;;  %s942_s19 = sphi %s994_s19, %s1209_s19   ;;  %s938_s18 = sphi %s992_s18, %s1244_s18   ;;  %s934_s17 = sphi %s990_s17, %s1243_s17   ;;  %s930_s16 = sphi %s988_s16, %s1242_s16   ;;  %s926_s15 = sphi %s986_s15, %s1241_s15  }
   0xe   : > { %s593_s24 = sadd.s32 4294967294, %s954_s22   ;;  %s39_s25 = sadd.s32 1, %s950_s21 }
   0xf   : > { %p41_p0 = scmp.ge.s32.totalorder %s39_s25, 2  ;;  %p923_p1 = scmp.ne.s32.totalorder %s942_s19, 0 }
  0x10   : > { %p60_p2 = scmp.eq.s32.totalorder %s954_s22, 0  ;;  %p65_p3 = scmp.ne.s32.totalorder %s942_s19, %s938_s18 }
  0x11   : > { %s1246_s25 = smov (%p41_p0, %s39_s25), 0  ;;  %p66_p5 = scmp.eq.s32.totalorder %s1025_s23, 0 }
  0x12   : > { %1230 = sst [smem:[#allocation16_spill]] %s1246_s25  ;;  %p1034_p4 = por %p923_p1, %p60_p2 }
  0x13   : > { %p1039_p6 = por %p66_p5, %p65_p3  ;;  %s139_s28 = ssub.s32 %s950_s21, %s1246_s25 }
  0x14   : > { %p140_p7 = scmp.eq.s32.totalorder %s139_s28, 0  ;;  %s142_s29 = sadd.s32 1, %s934_s17 }
  0x15   : > { %p152_p8 = scmp.ne.s32.totalorder %s934_s17, %s930_s16  ;;  %p153_p9 = scmp.eq.s32.totalorder %s1025_s23, 1 }
  0x16   : > { %s1047_s30 = scalar_select %p140_p7, %s934_s17, %s142_s29  }
  0x17   : > { %p158_p10 = scmp.ne.s32.totalorder %s930_s16, %s926_s15  ;;  %p159_p11 = scmp.eq.s32.totalorder %s593_s24, 1 }
  0x18   : > { %p1054_p12 = por %p153_p9, %p152_p8  ;;  %p595_p13 = scmp.ge.s32.totalorder %s954_s22, 2 }
  0x19   : > { %p1059_p0 = por %p159_p11, %p158_p10  ;;  %p648_p1 = scmp.lt.s32.totalorder %s954_s22, 2 }
  0x1a   : > { %s230_s8 = sand.u32 1, %s954_s22   ;;  %s956_s9 = smov [#allocation5]  }
  0x1b   : > { %p1066_p2 = pnand %p648_p1, %p1034_p4  ;;  %s245_s10 = sshll.u32 %s956_s9, 4  ;;  %s246_s10 = int_to_ptr.vmem [resolvable:$true] %s245_s10 }
  0x1c   : > { %s1236_s1 = sld [smem:[#allocation17_spill]]  ;;  %p605_p3 = scmp.ge.s32.totalorder %s954_s22, 1 }
  0x1d   : > { %s1075_s14 = scalar_lea.sflag [#allocation6], %s230_s8  ;;  %p729_p5 = pneg %p1066_p2 }
  0x22   : > { %s243_s13 = sshll.u32 %s1236_s1, 4  ;;  %s732_s29 = scalar_lea.hbm %s1236_s1, 16  ;;  %s244_s13 = int_to_ptr.hbm [resolvable:$true] %s243_s13 }
  0x23   : > { %s725_s18 = sshra.s32 %s244_s13, 4  ;;  %s726_s18 = int_to_ptr.hbm [resolvable:$true] %s725_s18 }
  0x24   : > { %s727_s24 = scalar_lea.hbm %s726_s18, 16 }
  0x25   : > { %p728_p4 = scmp.ne.s32.totalorder %s726_s18, %s727_s24  ;;  %p734_p9 = scmp.lt.s32.totalorder %s732_s29, %s727_s24 }
  0x27   : > { %p730_p7 = pnand %p729_p5, %p728_p4 }
  0x29   : > { %p731_p8 = pneg %p730_p7 }
  0x2b   : > { %p736_p10 = pnand %p734_p9, %p731_p8 }
  0x2d   : > { %739 = shalt.err (!%p736_p10)
}
  0x2e   : > { %s1224_s9 = smov 128   ;;  %s958_s8 = smov 8  }
  0x2f   : > { %637 = dma.hbm_to_vmem [thread:$0]  (!%p1066_p2), %s244_s13, 256, %s246_s10, %s1075_s14, %s1224_s9, %s1224_s9, %s958_s8  }
  0x30   : > { %p278_p11 = scmp.lt.s32.totalorder %s954_s22, 3  ;;  %s959_s12 = smov [#allocation2]  }
  0x31   : > { %s220_s18 = sshll.u32 %s959_s12, 4  ;;  %s218_s28 = sshll.u32 %s1219_s0, 4  ;;  %s221_s18 = int_to_ptr.vmem [resolvable:$true] %s220_s18  ;;  %s219_s28 = int_to_ptr.hbm [resolvable:$true] %s218_s28 }
  0x32   : > { %p1094_p1 = pnand %p605_p3, %p278_p11  ;;  %s755_s29 = sshra.s32 %s219_s28, 4  ;;  %s756_s29 = int_to_ptr.hbm [resolvable:$true] %s755_s29 }
  0x33   : > { %s757_s1 = scalar_lea.hbm %s756_s29, 16  ;;  %s762_s9 = scalar_lea.hbm %s1219_s0, 16 }
  0x34   : > { %p758_p4 = scmp.ne.s32.totalorder %s756_s29, %s757_s1  ;;  %p764_p3 = scmp.lt.s32.totalorder %s762_s9, %s757_s1 }
  0x36   : > { %p760_p7 = pnand %p758_p4, %p729_p5 }
  0x38   : > { %p761_p8 = pneg %p760_p7 }
  0x3a   : > { %p766_p9 = pnand %p764_p3, %p761_p8 }
  0x3c   : > { %769 = shalt.err (!%p766_p9)
}
  0x3d   : > { %s1238_s12 = smov 128   ;;  %s960_s24 = smov [#allocation7]  }
  0x3e   : > { %634 = dma.hbm_to_vmem [thread:$0]  (!%p1066_p2), %s219_s28, 256, %s221_s18, [#allocation3], %s1238_s12, %s1238_s12, %s958_s8  }
  0x3f   : > { %s270_s26 = sshll.u32 %s960_s24, 4  ;;  %s268_s21 = sshll.u32 %s1221_s2, 4  ;;  %s271_s26 = int_to_ptr.vmem [resolvable:$true] %s270_s26  ;;  %s269_s21 = int_to_ptr.hbm [resolvable:$true] %s268_s21 }
  0x40   : > { %s785_s10 = sshra.s32 %s269_s21, 4  ;;  %s792_s18 = scalar_lea.hbm %s1221_s2, 16  ;;  %s786_s10 = int_to_ptr.hbm [resolvable:$true] %s785_s10 }
  0x41   : > { %s787_s1 = scalar_lea.hbm %s786_s10, 16 }
  0x42   : > { %p788_p10 = scmp.ne.s32.totalorder %s786_s10, %s787_s1  ;;  %p794_p7 = scmp.lt.s32.totalorder %s792_s18, %s787_s1 }
  0x44   : > { %p790_p11 = pnand %p788_p10, %p729_p5 }
  0x46   : > { %p791_p4 = pneg %p790_p11 }
  0x48   : > { %p796_p8 = pnand %p794_p7, %p791_p4 }
  0x4a   : > { %799 = shalt.err (!%p796_p8)
}
  0x4b   : > { %640 = dma.hbm_to_vmem [thread:$0]  (!%p1066_p2), %s269_s21, 256, %s271_s26, %s1075_s14, %s1238_s12, %s1238_s12, %s958_s8  }
  0x4c   : > { %282 = sbr.rel (%p1094_p1) target bundleno = 116 (0x74), region = 32  ;;  %s284_s25 = sand.u32 (!%p1094_p1), 1, %s942_s19  }
  0x4d   : > { %s1130_s28 = sshll.u32 (!%p1094_p1), %s284_s25, 4  ;;  %s285_s24 = scalar_lea.sflag (!%p1094_p1), [#allocation3], %s284_s25 }
  0x4e   : > { %s288_s29 = scalar_lea.vmem (!%p1094_p1), [#allocation2], %s1130_s28 }
  0x51   : > { %908 = dma.done.wait (%p1039_p6), %s285_s24, 256  }
  0x52   : > { %910 = vsyncadd (%p1039_p6), %s285_s24, 4294967040  ;;  %s294_s21 = sand.u32 1, %s1025_s23   ;;  %s298_s14 = scalar_lea.vmem [#allocation5], %s1130_s28 }
  0x53   : > { %s295_s7 = scalar_lea.sflag [#allocation6], %s294_s21 }
  0x54   : > { %912 = dma.done.wait (%p1039_p6), %s295_s7, 512  }
  0x55   : > { %914 = vsyncadd (%p1039_p6), %s295_s7, 4294966784  ;;  %s611_s8 = sshll.u32 %s946_s20, 4  ;;  %v369_v0 = vlaneseq  ;;  %s1145_s11 = sand.u32 1, %s930_s16   ;;  %v377_v6 = vld [vmem:[%s288_s29] sm:$0xff]  ;;  %v378_v7 = vld [vmem:[%s288_s29 + $0x8] sm:$0xff] }
  0x56   : > { %v372_v1 = vstv %s611_s8  ;;  %s609_s23 = sshll.u32 %s1145_s11, 3  ;;  %v379_v8 = vld [vmem:[%s298_s14] sm:$0xff]  ;;  %s614_s27 = sshll.u32 %s946_s20, 3  ;;  %v380_v9 = vld [vmem:[%s298_s14 + $0x8] sm:$0xff] }
  0x57   : > { %v370_v2 = vshrl.u32 %v369_v0, 7  ;;  %v383_v10 = vsub.f32 %v377_v6, %v379_v8  ;;  %s308_s12 = scalar_lea.vmem [#allocation7], %s1130_s28  ;;  %v384_v13 = vsub.f32 %v378_v7, %v380_v9  ;;  %s419_s1 = scalar_lea.hbm %s1222_s3, %s614_s27 }
  0x58   : > { %v381_v11 = vld [vmem:[%s308_s12] sm:$0xff]  ;;  %v382_v12 = vld [vmem:[%s308_s12 + $0x8] sm:$0xff]  ;;  %s433_s13 = scalar_lea.hbm %s1223_s4, %s614_s27  ;;  %s341_s18 = scalar_lea.vmem [#allocation8], %s609_s23 }
  0x59   : > { %v371_v3 = vadd.s32 8, %v370_v2  ;;  %v373_v4 = vadd.s32 %v372_v1, %v370_v2  ;;  %v387_v14 = vsub.f32 %v381_v11, %v379_v8  ;;  %v388_v15 = vsub.f32 %v382_v12, %v380_v9  ;;  %s421_s25 = sshll.u32 %s341_s18, 4  ;;  %s423_s28 = sshll.u32 %s419_s1, 4  ;;  %s422_s25 = int_to_ptr.vmem [resolvable:$true] %s421_s25  ;;  %s424_s28 = int_to_ptr.hbm [resolvable:$true] %s423_s28 }
  0x5a   : > { %s348_s24 = scalar_lea.vmem [#allocation9], %s609_s23  ;;  %s437_s21 = sshll.u32 %s433_s13, 4  ;;  %s1164_s21 = int_to_ptr.hbm [resolvable:$true] %s437_s21 }
  0x5b   : > { %v374_v5 = vadd.s32 %v372_v1, %v371_v3  ;;  %vm375_vm0 = vcmp.lt.s32.totalorder %v373_v4, 16  ;;  %s435_s29 = sshll.u32 %s348_s24, 4  ;;  %s404_s7 = scalar_lea.sflag [#allocation4], %s1145_s11  ;;  %s1162_s29 = int_to_ptr.vmem [resolvable:$true] %s435_s29 }
  0x5c   : > { %v385_v16 = vsel %vm375_vm0, %v383_v10, 0.0  ;;  %v389_v19 = vsel %vm375_vm0, %v387_v14, 0.0  ;;  %s829_s14 = sshra.s32 %s424_s28, 4  ;;  %s835_s12 = scalar_lea.hbm %s1222_s3, 16  ;;  %s830_s14 = int_to_ptr.hbm [resolvable:$true] %s829_s14 }
  0x5d   : > { %vm376_vm1 = vcmp.lt.s32.totalorder %v374_v5, 16  ;;  %v392_v18 = vmul.f32 %v385_v16, %v385_v16  ;;  %v398_v22 = vmul.f32 %v389_v19, %v389_v19  ;;  %s831_s8 = scalar_lea.hbm %s830_s14, 8  ;;  %p836_p1 = scmp.lt.s32.totalorder %s830_s14, %s1222_s3 }
  0x5e   : > { %v386_v17 = vsel %vm376_vm1, %v384_v13, 0.0  ;;  %v390_v20 = vsel %vm376_vm1, %v388_v15, 0.0  ;;  %p832_p6 = scmp.ne.s32.totalorder %s830_s14, %s831_s8  ;;  %p837_p3 = scmp.lt.s32.totalorder %s835_s12, %s831_s8 }
  0x5f   : > { %v393_v21 = vmul.f32 %v386_v17, %v386_v17  ;;  %v399_v23 = vmul.f32 %v390_v20, %v390_v20 }
  0x60   : > { %p833_p2 = pnand %p832_p6, %p1054_p12  ;;  %p838_p9 = por %p837_p3, %p836_p1 }
  0x61   : > { %v394_v24 = vadd.f32 %v393_v21, %v392_v18  ;;  %v400_v25 = vadd.f32 %v399_v23, %v398_v22 }
  0x62   : > { %p834_p5 = pneg %p833_p2 }
  0x63   : > { %396 = vst [vmem:[%s341_s18] sm:$0xff] %v394_v24 }
  0x64   : > { %402 = vst [vmem:[%s348_s24] sm:$0xff] %v400_v25  ;;  %p839_p10 = pnand %p838_p9, %p834_p5 }
  0x66   : > { %842 = shalt.err (!%p839_p10)
}
  0x67   : > { %627 = dma.vmem_to_hbm [thread:$0]  (%p1054_p12), %s422_s25, 128, %s424_s28, %s404_s7  }
  0x68   : > { %s409_s1 = scalar_lea.sflag [#allocation10], %s1145_s11  ;;  %s857_s20 = sshra.s32 %s1164_s21, 4  ;;  %s858_s20 = int_to_ptr.hbm [resolvable:$true] %s857_s20 }
  0x69   : > { %s859_s9 = scalar_lea.hbm %s858_s20, 8  ;;  %s863_s24 = scalar_lea.hbm %s1223_s4, 16 }
  0x6a   : > { %p860_p11 = scmp.ne.s32.totalorder %s858_s20, %s859_s9  ;;  %p864_p8 = scmp.lt.s32.totalorder %s858_s20, %s1223_s4 }
  0x6b   : > { %p865_p6 = scmp.lt.s32.totalorder %s863_s24, %s859_s9 }
  0x6c   : > { %p861_p4 = pnand %p860_p11, %p1054_p12 }
  0x6d   : > { %p866_p2 = por %p865_p6, %p864_p8 }
  0x6e   : > { %p862_p7 = pneg %p861_p4 }
  0x70   : > { %p867_p5 = pnand %p866_p2, %p862_p7 }
  0x72   : > { %870 = shalt.err (!%p867_p5)
}
  0x73   : > { %628 = dma.vmem_to_hbm [thread:$0]  (%p1054_p12), %s1162_s29, 128, %s1164_s21, %s409_s1  }
  0x74 PF: > { %s449_s11 = sand.u32 1, %s926_s15   ;;  %p642_p1 = pnand %p595_p13, %p1059_p0 }
  0x75   : > { %s450_s25 = scalar_lea.sflag [#allocation4], %s449_s11 }
  0x76   : > { %p643_p3 = pneg %p642_p1 }
  0x78   : > { %916 = dma.done.wait (%p643_p3), %s450_s25, 128  }
  0x79   : > { %918 = vsyncadd (%p643_p3), %s450_s25, 4294967168  ;;  %s460_s28 = scalar_lea.sflag [#allocation10], %s449_s11 }
  0x7a   : > { %920 = dma.done.wait (%p643_p3), %s460_s28, 128  }
  0x7b   : > { %922 = vsyncadd (%p643_p3), %s460_s28, 4294967168  ;;  %s27_s22 = sadd.s32 1, %s954_s22   ;;  %s1239_s20 = sld [smem:[#allocation15_spill]] }
  0x7c   : > { %p24_p9 = scmp.ge.s32.totalorder %s27_s22, 4   ;;  %s1240_s21 = sld [smem:[#allocation16_spill]] }
  0x7d   : > { %s1241_s15 = smov %s930_s16  ;;  %s1242_s16 = smov %s934_s17 }
  0x7e   : > { %s1243_s17 = smov %s1047_s30  ;;  %s1244_s18 = smov %s942_s19 }
  0x7f   : > { %s1209_s19 = smov 0   ;;  %26 = sbr.rel (!%p24_p9) target bundleno = 13 (0xd), region = 122 }
  0x84   :  { %466 = vsyncpa [#allocation3], 1 }
  0x85   :  { %468 = vsyncpa [#allocation3 + $0x1], 1 }
  0x86   :  { %469 = vsyncpa [#allocation6], 1 }
  0x87   :  { %471 = vsyncpa [#allocation6 + $0x1], 1 }
  0x88   :  { %472 = vsyncpa [#allocation4], 1 }
  0x89   :  { %474 = vsyncpa [#allocation4 + $0x1], 1 }
  0x8a   :  { %475 = vsyncpa [#allocation10], 1 }
  0x8b   :  { %477 = vsyncpa [#allocation10 + $0x1], 1 }

</bundles_post_ra>
